<compile_context>
chip_gen: v5e
topology: v5e:2x2
jax: 0.10.0
libtpu: 0.0.40
codegen_flags: <defaults>
</compile_context>

<pallas_src>
import functools

import jax
import jax.numpy as jnp
from jax.experimental import pallas as pl
from jax.experimental.pallas import tpu as pltpu

_LANES = 128


def _scale_kernel(x_ref, o_ref, *, scale):
    # x_ref / o_ref: (TR, 128) VMEM tiles. Single VPU multiply; `scale` is a
    # compile-time Python float (weak-typed, so the math stays in x's dtype).
    o_ref[...] = x_ref[...] * scale


def uniform_box_warp(coordinates: jax.Array, sidelength: float,
                     *, max_block_rows: int | None = None) -> jax.Array:
    """out = coordinates * (2 / sidelength); same shape & dtype as input."""
    scale = 2.0 / float(sidelength)
    dtype = coordinates.dtype

    # Non-floating inputs: match PyTorch's scalar*tensor promotion in plain JAX.
    if not jnp.issubdtype(dtype, jnp.floating):
        return coordinates * scale

    orig_shape = coordinates.shape
    n = coordinates.size
    if n == 0:
        return coordinates

    itemsize = jnp.dtype(dtype).itemsize
    sublane = max(8, 32 // itemsize)   # 8 for f32, 16 for bf16/f16

    # Flatten (free for a contiguous array) and view as (rows, 128).
    flat = coordinates.reshape(-1)
    rem = n % _LANES
    if rem == 0:
        x2d = flat.reshape(n // _LANES, _LANES)
        padded = False
    else:
        # TODO(synk): non-128-aligned numel costs one extra pad pass + one slice
        # pass over the array; unavoidable without a dedicated tail kernel.
        x2d = jnp.pad(flat, (0, _LANES - rem)).reshape(-1, _LANES)
        padded = True

    n_rows = x2d.shape[0]

    # ~4 MiB blocks, always a multiple of the sublane packing for this dtype.
    target_rows = (4 * 1024 * 1024) // (_LANES * itemsize)
    if max_block_rows is not None:
        target_rows = min(target_rows, max_block_rows)
    target_rows = max(sublane, (target_rows // sublane) * sublane)

    if n_rows <= target_rows:
        tr = n_rows          # single block == full array dim -> always legal
    else:
        tr = target_rows     # edge block (if any) is masked automatically
    grid = (pl.cdiv(n_rows, tr),)

    kernel = functools.partial(_scale_kernel, scale=scale)

    out2d = pl.pallas_call(
        kernel,
        out_shape=jax.ShapeDtypeStruct(x2d.shape, dtype),
        grid=grid,
        in_specs=[pl.BlockSpec((tr, _LANES), lambda i: (i, 0))],
        out_specs=pl.BlockSpec((tr, _LANES), lambda i: (i, 0)),
        compiler_params=pltpu.CompilerParams(
            dimension_semantics=("parallel",),
        ),
        cost_estimate=pl.CostEstimate(
            flops=x2d.size,
            transcendentals=0,
            bytes_accessed=2 * x2d.size * itemsize,
        ),
    )(x2d)

    if padded:
        return out2d.reshape(-1)[:n].reshape(orig_shape)
    return out2d.reshape(orig_shape)


if __name__ == "__main__":
    key = jax.random.PRNGKey(0)
    sidelength = 0.24  # deterministic "module init" hyperparameter
    scale = 2.0 / sidelength

    # (1) Typical NeRF-style coordinates; numel % 128 == 0 -> zero-glue fast path.
    coords = jax.random.normal(key, (2, 64, 3), dtype=jnp.float32)
    out = jax.block_until_ready(uniform_box_warp(coords, sidelength))
    ref = coords * scale
    assert out.shape == coords.shape and out.dtype == coords.dtype
    assert jnp.allclose(out, ref, rtol=1e-6, atol=1e-6)

    # (2) Non-128-aligned numel -> pad/slice fallback path.
    k1, k2 = jax.random.split(key)
    coords2 = jax.random.normal(k1, (4, 111, 3), dtype=jnp.float32)
    out2 = jax.block_until_ready(uniform_box_warp(coords2, sidelength))
    assert out2.shape == coords2.shape and out2.dtype == coords2.dtype
    assert jnp.allclose(out2, coords2 * scale, rtol=1e-6, atol=1e-6)

    # (3) Multi-step grid with a masked edge block (small max_block_rows keeps
    #     the test shape tiny while exercising the non-divisible-grid path).
    coords3 = jax.random.normal(k2, (6, 128, 3), dtype=jnp.float32)
    out3 = jax.block_until_ready(
        uniform_box_warp(coords3, sidelength, max_block_rows=16))
    assert jnp.allclose(out3, coords3 * scale, rtol=1e-6, atol=1e-6)

    # (4) bfloat16 dtype (scale kept as a Python float -> no low-precision
    #     pre-cast of the scale constant outside the multiply itself).
    coords4 = jax.random.normal(key, (2, 64, 3), dtype=jnp.bfloat16)
    out4 = jax.block_until_ready(uniform_box_warp(coords4, sidelength))
    assert out4.dtype == jnp.bfloat16 and out4.shape == coords4.shape
    assert jnp.allclose(out4.astype(jnp.float32),
                        (coords4 * scale).astype(jnp.float32),
                        rtol=1e-2, atol=1e-2)

    print("KERNEL_OK")
</pallas_src>

<mosaic_0001>
module attributes {stable_mosaic.version = 11 : i64} {
  func.func @_scale_kernel(%arg0: i32, %arg1: memref<3x128xf32, #tpu.memory_space<vmem>>, %arg2: memref<3x128xf32, #tpu.memory_space<vmem>>) attributes {dimension_semantics = [#tpu.dimension_semantics<parallel>], iteration_bounds = array<i64: 1>, scalar_prefetch = 0 : i64, scratch_operands = 0 : i64, tpu.core_type = #tpu.core_type<tc>, window_params = [{transform_indices = @transform_0, window_bounds = array<i64: 3, 128>}, {transform_indices = @transform_1, window_bounds = array<i64: 3, 128>}]} {
    %c0 = arith.constant 0 : index
    %c0_0 = arith.constant 0 : index
    %0 = vector.load %arg1[%c0, %c0_0] : memref<3x128xf32, #tpu.memory_space<vmem>>, vector<3x128xf32>
    %cst = arith.constant 8.33333301 : f32
    %1 = vector.broadcast %cst : f32 to vector<3x128xf32>
    %2 = arith.mulf %0, %1 : vector<3x128xf32>
    %c0_1 = arith.constant 0 : index
    %c0_2 = arith.constant 0 : index
    %3 = vector.load %arg2[%c0_1, %c0_2] : memref<3x128xf32, #tpu.memory_space<vmem>>, vector<3x128xf32>
    tpu.vector_store %arg2[%c0_1, %c0_2], %2 {strides = array<i32>} : memref<3x128xf32, #tpu.memory_space<vmem>>, vector<3x128xf32>,
    return
  }
  func.func @transform_0(%arg0: i32) -> (i32, i32) {
    %c0_i32 = arith.constant 0 : i32
    %c0_i32_0 = arith.constant 0 : i32
    return %arg0, %c0_i32 : i32, i32
  }
  func.func @transform_1(%arg0: i32) -> (i32, i32) {
    %c0_i32 = arith.constant 0 : i32
    %c0_i32_0 = arith.constant 0 : i32
    return %arg0, %c0_i32 : i32, i32
  }
}

</mosaic_0001>

<bundles_post_ra>
// kernel: tpu_custom_call.1
= control target key start
LH: loop header
LB: loop body
LE: loop exit
PB: predicated region body
PF: predicated region fallthrough
CT: control target
= control target key end

     0   :  { %6 = vsyncpa [#allocation3], 0  ;;  %s115_s0 = inlined_call_operand.hbm [shape: f32[3,128], index: 0, kind: input, shape index: {}]   ;;  %s116_s1 = inlined_call_operand.hbm [shape: f32[3,128], index: 1, kind: output, shape index: {}]  }
   0x1   :  { %7 = vsyncpa [#allocation4], 0  ;;  %s13_s8 = sshll.u32 %s115_s0, 4  ;;  %s97_s9 = smov [#allocation2]   ;;  %s14_s8 = int_to_ptr.hbm [resolvable:$true] %s13_s8 }
   0x2   :  { %s15_s10 = sshll.u32 %s97_s9, 4  ;;  %s16_s10 = int_to_ptr.vmem [resolvable:$true] %s15_s10 }
   0x3   :  { %18 = dma.hbm_to_vmem [thread:$0]  %s14_s8, 64, %s16_s10, [#allocation3]  }
   0x4   :  { %93 = dma.done.wait [#allocation3], 64  }
   0x5   :  { %94 = vsyncadd [#allocation3], 4294967232  ;;  %s98_s11 = smov [#allocation5]   ;;  %s33_s15 = sshll.u32 %s116_s1, 4  ;;  %v23_v0 = vld [vmem:[#allocation2] sm:$0x7]  ;;  %s34_s15 = int_to_ptr.hbm [resolvable:$true] %s33_s15 }
   0x6   :  { %s31_s12 = sshll.u32 %s98_s11, 4  ;;  %v24_v1 = vmul.f32 8.333333, %v23_v0  ;;  %s32_s12 = int_to_ptr.vmem [resolvable:$true] %s31_s12 }
   0x8   :  { %25 = vst [vmem:[#allocation5] sm:$0x7] %v24_v1 }
   0x9   :  { %36 = dma.vmem_to_hbm [thread:$0]  %s32_s12, 64, %s34_s15, [#allocation4]  }
   0xa   :  { %95 = dma.done.wait [#allocation4], 64  }
   0xb   :  { %96 = vsyncadd [#allocation4], 4294967232 }
   0xc   :  { %41 = vsyncpa [#allocation3], 1 }
   0xd   :  { %42 = vsyncpa [#allocation4], 1 }

</bundles_post_ra>
